<compile_context>
chip_gen: v6e
topology: v6e:2x2x1
jax: 0.10.0
libtpu: 0.0.40
codegen_flags: <defaults>
</compile_context>

<pallas_src>
import functools

import jax
import jax.numpy as jnp
from jax.experimental import pallas as pl
from jax.experimental.pallas import tpu as pltpu


def _sublane_align(dtype):
    # Rows per vreg sublane group: 8 for fp32, 16 for bf16, 32 for int8.
    return 8 * max(1, 4 // jnp.dtype(dtype).itemsize)


def _pick_tile(n, target, align):
    """Largest divisor of n <= target that is a multiple of `align` (fallback 8)."""
    upper = min(target, n)
    for a in (align, 8):
        for t in range(upper, a - 1, -1):
            if n % t == 0 and t % a == 0:
                return t
    return n


def _vmem_cap_bytes():
    """Generation-aware VMEM cap with ~16 MiB headroom for Mosaic scratch."""
    try:
        phys = int(pltpu.get_tpu_info().vmem_capacity_bytes)
    except Exception:
        phys = 64 << 20  # assume the smallest per-TC VMEM (v7x)
    return max(phys - (16 << 20), 32 << 20)


def _embed_kernel(x_ref, w_ref, b_ref, g_ref, pos_ref, o_ref, *, eps, inv_d):
    # x_ref: (TN, K); w_ref: (K, D); b/g: (1, D); pos: (TN, D); o: (TN, D)
    # Patch conv (kernel == stride == patch) == matmul on the MXU, fp32 acc.
    h = jnp.dot(x_ref[...], w_ref[...], preferred_element_type=jnp.float32)
    h = h + b_ref[...].astype(jnp.float32)                       # (TN, D) fp32
    # RMSNorm: fp32 stats (XLU reduce) + EUP rsqrt; keep the whole elementwise
    # tail in fp32 (v5e has no bf16 VPU) and cast exactly once at the store.
    var = jnp.sum(h * h, axis=-1, keepdims=True) * inv_d
    hn = h * jax.lax.rsqrt(var + eps)
    hn = hn * g_ref[...].astype(jnp.float32)
    o_ref[...] = (hn + pos_ref[...].astype(jnp.float32)).astype(o_ref.dtype)


def aimv2_vision_embeddings(pixel_values, conv_w, conv_b, rms_w, pos_emb,
                            patch_size, rms_eps, *,
                            compute_dtype=jnp.bfloat16,
                            param_dtype=None,   # dtype for pos/bias/gamma streams
                            out_dtype=None,     # output dtype (default: pixel dtype)
                            tn=512):
    """pixel_values: (B, C, H, W) NCHW.  Returns (B, N, D)."""
    B, C, H, W = pixel_values.shape
    D = conv_w.shape[0]
    p = patch_size
    nh, nw = H // p, W // p
    N = nh * nw
    K = C * p * p
    out_dt = out_dtype if out_dtype is not None else pixel_values.dtype

    # --- glue: non-overlapping patch extraction in (c, kh, kw) order to match
    # PyTorch conv weight.flatten(1).  No K padding: the MXU pads internally,
    # so HBM only carries the useful bytes.
    # TODO(synk): fuse the patch rearrangement into the kernel (BlockSpec over
    # (1, C, p*rows, W) pixel rows) to remove this extra HBM round trip of x.
    x = pixel_values.reshape(B, C, nh, p, nw, p)
    x = jnp.transpose(x, (0, 2, 4, 1, 3, 5)).reshape(B, N, K)
    x = x.astype(compute_dtype)
    w_flat = conv_w.reshape(D, K).T.astype(compute_dtype)         # (K, D)

    pdt = param_dtype if param_dtype is not None else pos_emb.dtype
    b2 = conv_b.reshape(1, D).astype(pdt)
    g2 = rms_w.reshape(1, D).astype(pdt)
    pos = pos_emb.astype(pdt)

    # --- tile choice: big tiles amortize per-step overhead; prefer bf16
    # sublane alignment; keep >= 2 grid steps when B == 1 (v7x has 2 TCs).
    align = _sublane_align(compute_dtype)
    target = tn
    if B == 1 and N >= 2 * align:
        target = min(target, N // 2)
    TN = _pick_tile(N, target, align)
    grid = (N // TN, B)   # batch innermost -> pos block index constant, no re-DMA

    # VMEM budget: double-buffered tiles + weight + fp32 intermediates.
    cd = jnp.dtype(compute_dtype).itemsize
    od = jnp.dtype(out_dt).itemsize
    pd = jnp.dtype(pdt).itemsize
    vmem_bytes = (2 * TN * K * cd          # x tile
                  + 2 * TN * D * pd        # pos tile
                  + 2 * TN * D * od        # out tile
                  + 2 * K * D * cd         # weight (constant index)
                  + 4 * 8 * D * pd         # bias + gamma (sublane-padded)
                  + 2 * TN * D * 4)        # fp32 intermediates (h, hn)
    vmem_limit = int(min(max(2 * vmem_bytes, 16 << 20), _vmem_cap_bytes()))

    kernel = functools.partial(_embed_kernel, eps=float(rms_eps), inv_d=1.0 / D)
    out = pl.pallas_call(
        kernel,
        out_shape=jax.ShapeDtypeStruct((B, N, D), out_dt),
        grid_spec=pltpu.PrefetchScalarGridSpec(
            num_scalar_prefetch=0,
            grid=grid,
            in_specs=[
                pl.BlockSpec((None, TN, K), lambda n, b: (b, n, 0)),  # patches
                pl.BlockSpec((K, D), lambda n, b: (0, 0)),            # weight
                pl.BlockSpec((1, D), lambda n, b: (0, 0)),            # bias
                pl.BlockSpec((1, D), lambda n, b: (0, 0)),            # gamma
                pl.BlockSpec((TN, D), lambda n, b: (n, 0)),           # pos emb
            ],
            out_specs=pl.BlockSpec((None, TN, D), lambda n, b: (b, n, 0)),
        ),
        compiler_params=pltpu.CompilerParams(
            dimension_semantics=("parallel", "parallel"),
            vmem_limit_bytes=vmem_limit),
    )(x, w_flat, b2, g2, pos)
    return out


def _reference(pixel_values, conv_w, conv_b, rms_w, pos_emb, patch_size, rms_eps):
    # Pure-JAX reference mirroring the PyTorch forward (fp32, learned pos path).
    # TODO(synk): is_native=True (on-the-fly 2D sincos pos embedding) not implemented.
    B, C, H, W = pixel_values.shape
    D = conv_w.shape[0]
    p = patch_size
    h = jax.lax.conv_general_dilated(
        pixel_values, conv_w, window_strides=(p, p), padding="VALID",
        dimension_numbers=("NCHW", "OIHW", "NCHW"))
    h = h + conv_b.reshape(1, D, 1, 1)
    h = h.reshape(B, D, -1).transpose(0, 2, 1)                    # (B, N, D)
    hf = h.astype(jnp.float32)
    var = jnp.mean(hf * hf, axis=-1, keepdims=True)
    hn = (hf * jax.lax.rsqrt(var + rms_eps)).astype(h.dtype) * rms_w
    return hn + pos_emb[None]


if __name__ == "__main__":
    # Small config consistent with Aimv2VisionConfig semantics.
    batch = 2
    num_channels = 3
    image_size = 64
    patch_size = 4
    hidden_size = 128          # multiple of 128 -> lane-dense output stores
    rms_eps = 1e-5
    num_patches = (image_size // patch_size) ** 2                 # 256

    key = jax.random.PRNGKey(0)
    k1, k2, k3, k4, k5 = jax.random.split(key, 5)
    pixel_values = jax.random.normal(
        k1, (batch, num_channels, image_size, image_size), jnp.float32)
    conv_w = 0.02 * jax.random.normal(
        k2, (hidden_size, num_channels, patch_size, patch_size), jnp.float32)
    conv_b = 0.02 * jax.random.normal(k3, (hidden_size,), jnp.float32)
    rms_w = 1.0 + 0.02 * jax.random.normal(k4, (hidden_size,), jnp.float32)
    pos_emb = 0.02 * jax.random.normal(
        k5, (num_patches, hidden_size), jnp.float32)

    ref = _reference(
        pixel_values, conv_w, conv_b, rms_w, pos_emb, patch_size, rms_eps)

    # Exactness check with fp32 compute and fp32 streams.
    out_fp32 = aimv2_vision_embeddings(
        pixel_values, conv_w, conv_b, rms_w, pos_emb, patch_size, rms_eps,
        compute_dtype=jnp.float32)
    out_fp32 = jax.block_until_ready(out_fp32)
    assert out_fp32.shape == (batch, num_patches, hidden_size)
    assert jnp.allclose(out_fp32, ref, atol=1e-3, rtol=1e-3)

    # Performance path: bf16 MXU matmul (fp32 acc) + bf16 pos/bias/gamma/out streams.
    out_bf16 = aimv2_vision_embeddings(
        pixel_values, conv_w, conv_b, rms_w, pos_emb, patch_size, rms_eps,
        compute_dtype=jnp.bfloat16, param_dtype=jnp.bfloat16,
        out_dtype=jnp.bfloat16)
    out_bf16 = jax.block_until_ready(out_bf16)
    assert out_bf16.shape == (batch, num_patches, hidden_size)
    assert jnp.allclose(out_bf16.astype(jnp.float32), ref, atol=0.12, rtol=0.08)

    print("KERNEL_OK")
</pallas_src>

<mosaic_0001>
module attributes {stable_mosaic.version = 11 : i64} {
  func.func @_embed_kernel(%arg0: i32, %arg1: i32, %arg2: memref<1x256x48xf32, #tpu.memory_space<vmem>>, %arg3: memref<48x128xf32, #tpu.memory_space<vmem>>, %arg4: memref<1x128xf32, #tpu.memory_space<vmem>>, %arg5: memref<1x128xf32, #tpu.memory_space<vmem>>, %arg6: memref<256x128xf32, #tpu.memory_space<vmem>>, %arg7: memref<1x256x128xf32, #tpu.memory_space<vmem>>) attributes {dimension_semantics = [#tpu.dimension_semantics<parallel>, #tpu.dimension_semantics<parallel>], iteration_bounds = array<i64: 1, 2>, scalar_prefetch = 0 : i64, scratch_operands = 0 : i64, tpu.core_type = #tpu.core_type<tc>, window_params = [{transform_indices = @transform_0, window_bounds = array<i64: 1, 256, 48>}, {pipeline_mode = #tpu.pipeline_mode<synchronous>, transform_indices = @transform_1, window_bounds = array<i64: 48, 128>}, {pipeline_mode = #tpu.pipeline_mode<synchronous>, transform_indices = @transform_2, window_bounds = array<i64: 1, 128>}, {pipeline_mode = #tpu.pipeline_mode<synchronous>, transform_indices = @transform_3, window_bounds = array<i64: 1, 128>}, {transform_indices = @transform_4, window_bounds = array<i64: 256, 128>}, {transform_indices = @transform_5, window_bounds = array<i64: 1, 256, 128>}]} {
    %c0 = arith.constant 0 : index
    %c0_0 = arith.constant 0 : index
    %c0_1 = arith.constant 0 : index
    %0 = vector.load %arg2[%c0, %c0_0, %c0_1] : memref<1x256x48xf32, #tpu.memory_space<vmem>>, vector<1x256x48xf32>
    %1 = vector.shape_cast %0 : vector<1x256x48xf32> to vector<256x48xf32>
    %c0_2 = arith.constant 0 : index
    %c0_3 = arith.constant 0 : index
    %2 = vector.load %arg3[%c0_2, %c0_3] : memref<48x128xf32, #tpu.memory_space<vmem>>, vector<48x128xf32>
    %cst = arith.constant dense<0.000000e+00> : vector<256x128xf32>
    %3 = tpu.matmul %1, %2, %cst {dimension_numbers = #tpu.dot_dimension_numbers<[1], [0], [0], [1], [0, 0, 1, 1], [], []>} : vector<256x48xf32>, vector<48x128xf32>, vector<256x128xf32> -> vector<256x128xf32>
    %c0_4 = arith.constant 0 : index
    %c0_5 = arith.constant 0 : index
    %4 = vector.load %arg4[%c0_4, %c0_5] : memref<1x128xf32, #tpu.memory_space<vmem>>, vector<1x128xf32>
    %5 = vector.broadcast %4 : vector<1x128xf32> to vector<256x128xf32>
    %6 = arith.addf %3, %5 : vector<256x128xf32>
    %7 = arith.mulf %6, %6 : vector<256x128xf32>
    %cst_6 = arith.constant dense<0.000000e+00> : vector<256xf32>
    %8 = vector.multi_reduction <add>, %7, %cst_6 [1] : vector<256x128xf32> to vector<256xf32>
    %9 = vector.shape_cast %8 : vector<256xf32> to vector<256x1xf32>
    %cst_7 = arith.constant 7.812500e-03 : f32
    %10 = vector.broadcast %cst_7 : f32 to vector<256x1xf32>
    %11 = arith.mulf %9, %10 : vector<256x1xf32>
    %cst_8 = arith.constant 9.99999974E-6 : f32
    %12 = vector.broadcast %cst_8 : f32 to vector<256x1xf32>
    %13 = arith.addf %11, %12 : vector<256x1xf32>
    %14 = math.rsqrt %13 : vector<256x1xf32>
    %15 = vector.broadcast %14 : vector<256x1xf32> to vector<256x128xf32>
    %16 = arith.mulf %6, %15 : vector<256x128xf32>
    %c0_9 = arith.constant 0 : index
    %c0_10 = arith.constant 0 : index
    %17 = vector.load %arg5[%c0_9, %c0_10] : memref<1x128xf32, #tpu.memory_space<vmem>>, vector<1x128xf32>
    %18 = vector.broadcast %17 : vector<1x128xf32> to vector<256x128xf32>
    %19 = arith.mulf %16, %18 : vector<256x128xf32>
    %c0_11 = arith.constant 0 : index
    %c0_12 = arith.constant 0 : index
    %20 = vector.load %arg6[%c0_11, %c0_12] : memref<256x128xf32, #tpu.memory_space<vmem>>, vector<256x128xf32>
    %21 = arith.addf %19, %20 : vector<256x128xf32>
    %c0_13 = arith.constant 0 : index
    %c0_14 = arith.constant 0 : index
    %c0_15 = arith.constant 0 : index
    %22 = vector.load %arg7[%c0_13, %c0_14, %c0_15] : memref<1x256x128xf32, #tpu.memory_space<vmem>>, vector<1x256x128xf32>
    %23 = vector.shape_cast %22 : vector<1x256x128xf32> to vector<256x128xf32>
    %24 = vector.shape_cast %21 : vector<256x128xf32> to vector<1x256x128xf32>
    tpu.vector_store %arg7[%c0_13, %c0_14, %c0_15], %24 {strides = array<i32>} : memref<1x256x128xf32, #tpu.memory_space<vmem>>, vector<1x256x128xf32>,
    return
  }
  func.func @transform_0(%arg0: i32, %arg1: i32) -> (i32, i32, i32) {
    %c0_i32 = arith.constant 0 : i32
    %c0_i32_0 = arith.constant 0 : i32
    return %arg1, %arg0, %c0_i32 : i32, i32, i32
  }
  func.func @transform_1(%arg0: i32, %arg1: i32) -> (i32, i32) {
    %c0_i32 = arith.constant 0 : i32
    %c0_i32_0 = arith.constant 0 : i32
    %c0_i32_1 = arith.constant 0 : i32
    return %c0_i32, %c0_i32_0 : i32, i32
  }
  func.func @transform_2(%arg0: i32, %arg1: i32) -> (i32, i32) {
    %c0_i32 = arith.constant 0 : i32
    %c0_i32_0 = arith.constant 0 : i32
    %c0_i32_1 = arith.constant 0 : i32
    return %c0_i32, %c0_i32_0 : i32, i32
  }
  func.func @transform_3(%arg0: i32, %arg1: i32) -> (i32, i32) {
    %c0_i32 = arith.constant 0 : i32
    %c0_i32_0 = arith.constant 0 : i32
    %c0_i32_1 = arith.constant 0 : i32
    return %c0_i32, %c0_i32_0 : i32, i32
  }
  func.func @transform_4(%arg0: i32, %arg1: i32) -> (i32, i32) {
    %c0_i32 = arith.constant 0 : i32
    %c0_i32_0 = arith.constant 0 : i32
    return %arg0, %c0_i32 : i32, i32
  }
  func.func @transform_5(%arg0: i32, %arg1: i32) -> (i32, i32, i32) {
    %c0_i32 = arith.constant 0 : i32
    %c0_i32_0 = arith.constant 0 : i32
    return %arg1, %arg0, %c0_i32 : i32, i32, i32
  }
}

</mosaic_0001>

<bundles_post_ra>
// kernel: tpu_custom_call.1
= control target key start
LH: loop header
LB: loop body
LE: loop exit
PB: predicated region body
PF: predicated region fallthrough
CT: control target
= control target key end

     0   :  { %10 = vsyncpa [#allocation3], 0  ;;  %s2071_s0 = inlined_call_operand.vmem [shape: f32[2,256,48], index: 0, kind: input, shape index: {}]   ;;  %s2072_s1 = inlined_call_operand.vmem [shape: f32[48,128], index: 1, kind: input, shape index: {}]   ;;  %s2073_s2 = inlined_call_operand.vmem [shape: f32[1,128], index: 2, kind: input, shape index: {}]   ;;  %s2074_s3 = inlined_call_operand.vmem [shape: f32[1,128], index: 3, kind: input, shape index: {}]   ;;  %s2075_s4 = inlined_call_operand.vmem [shape: f32[256,128], index: 4, kind: input, shape index: {}]   ;;  %s2076_s5 = inlined_call_operand.hbm [shape: f32[2,256,128], index: 5, kind: output, shape index: {}]  }
   0x1   :  { %12 = vsyncpa [#allocation3 + $0x1], 0  ;;  %s1504_s18 = smov 0   ;;  %s1506_s19 = smov 0  }
   0x2   :  { %s1508_s20 = smov 0   ;;  %s1510_s21 = smov 0  }
   0x3   :  { %s1512_s22 = smov 0   ;;  %s1514_s23 = smov 0  }
   0x4 LB: > { %s1112_s24 = sadd.s32 4294967295, %s1469_s23   ;;  %s1113_s25 = sadd.s32 4294967294, %s1469_s23   ;;  %s1469_s23 = sphi %s1514_s23, %s18_s23   ;;  %s1465_s22 = sphi %s1512_s22, %s2083_s22   ;;  %s1461_s21 = sphi %s1510_s21, %s2082_s21   ;;  %s1457_s20 = sphi %s1508_s20, %s2081_s20   ;;  %s1453_s19 = sphi %s1506_s19, %s2080_s19   ;;  %s1449_s18 = sphi %s1504_s18, %s2079_s18  }
   0x5   : > { %s27_s26 = sadd.s32 1, %s1465_s22  ;;  %s156_s27 = sadd.s32 1, %s1457_s20 }
   0x6   : > { %p28_p0 = scmp.ge.s32.totalorder %s27_s26, 2  ;;  %p166_p1 = scmp.ne.s32.totalorder %s1457_s20, %s1453_s19 }
   0x7   : > { %p167_p2 = scmp.eq.s32.totalorder %s1112_s24, 1  ;;  %p172_p3 = scmp.ne.s32.totalorder %s1453_s19, %s1449_s18 }
   0x8   : > { %s2085_s26 = smov (%p28_p0, %s27_s26), 0  ;;  %p173_p5 = scmp.eq.s32.totalorder %s1113_s25, 1 }
   0x9   : > { %p1544_p4 = por %p167_p2, %p166_p1  ;;  %s151_s29 = ssub.s32 %s1465_s22, %s2085_s26 }
   0xa   : > { %p1117_p6 = scmp.ge.s32.totalorder %s1469_s23, 1  ;;  %p154_p7 = scmp.eq.s32.totalorder %s151_s29, 0 }
   0xb   : > { %p1551_p8 = por %p173_p5, %p172_p3  ;;  %p222_p9 = scmp.lt.s32.totalorder %s1469_s23, 3 }
   0xc   : > { %s1557_s6 = scalar_select %p154_p7, %s1457_s20, %s156_s27  }
   0xd   : > { %p223_p10 = pnand %p1117_p6, %p222_p9 }
   0xe   : > { %p260_p11 = scmp.lt.s32.totalorder (!%p223_p10), %s1461_s21, 1  ;;  %s256_s11 = sand.u32 (!%p223_p10), 1, %s1453_s19  }
   0xf   : > { %226 = sbr.rel (%p223_p10) target bundleno = 468 (0x1d4), region = 40  ;;  %s1118_s14 = sshll.u32 (!%p223_p10), %s256_s11, 8 }
  0x10   : > { %s1161_s12 = sshll.u32 (!%p223_p10), %s1461_s21, 12  ;;  %s1471_s27 = smov (!%p223_p10), [#allocation2]  }
  0x11   : > { %s2018_s24 = scalar_lea.hbm (!%p223_p10), %s2076_s5, %s1161_s12  ;;  %s1397_s7 = sshll.u32 (!%p223_p10), %s1471_s27, 4  ;;  %s1398_s7 = int_to_ptr.vmem [resolvable:$false] %s1397_s7 }
  0x12   : > { %s1399_s8 = scalar_lea.vmem (!%p223_p10), %s1398_s7, 8192 }
  0x14   : > { %v313_v0 = vld [vmem:[%s2072_s1 + $0x28] sm:$0xff]  ;;  %v312_v1 = vld [vmem:[%s2072_s1 + $0x20] sm:$0xff]  ;;  %v311_v2 = vld [vmem:[%s2072_s1 + $0x18] sm:$0xff]  ;;  %s261_s13 = scalar_select %p260_p11, %s1461_s21, 1  ;;  %vm321_vm0 = vcmask 392192  }
  0x15   : > { %1200 = vmatprep.subr.mxu0 %v313_v0  ;;  %1260 = vmatprep.subr.mxu1 %v313_v0  ;;  %v310_v3 = vld [vmem:[%s2072_s1 + $0x10] sm:$0xff]  ;;  %v309_v4 = vld [vmem:[%s2072_s1 + $0x8] sm:$0xff]  ;;  %v308_v5 = vld [vmem:[%s2072_s1] sm:$0xff]  ;;  %s2026_s21 = scalar_lea.sflag [#allocation3], %s256_s11 }
  0x16   : > { %1201 = vmatpush3.msra.mxu0 %v313_v0  ;;  %1266 = vmatpush3.msra.mxu1 %v313_v0  ;;  %s1160_s16 = sshll.u32 %s261_s13, 8  ;;  %v1651_v38 = vld [vmem:[%s2073_s2] ss:$0 sm:$0xff] }
  0x17   : > { %1202 = vmatprep.subr.mxu0 %v312_v1  ;;  %1261 = vmatprep.subr.mxu1 %v312_v1  ;;  %s1579_s29 = scalar_lea.vmem %s2071_s0, %s1160_s16 }
  0x18   : > { %1203 = vmatpush3.msra.mxu0 %v312_v1  ;;  %1267 = vmatpush3.msra.mxu1 %v312_v1  ;;  %v276_v6 = vld [vmem:[%s1579_s29] sm:$0xff]  ;;  %v277_v8 = vld [vmem:[%s1579_s29 + $0x8] sm:$0xff]  ;;  %v278_v10 = vld [vmem:[%s1579_s29 + $0x10] sm:$0xff] }
  0x19   : > { %1204 = vmatprep.subr.mxu0 %v311_v2  ;;  %1262 = vmatprep.subr.mxu1 %v311_v2  ;;  %v292_v7 = vld [vmem:[%s1579_s29 + $0x80] sm:$0xff]  ;;  %v293_v9 = vld [vmem:[%s1579_s29 + $0x88] sm:$0xff]  ;;  %v294_v11 = vld [vmem:[%s1579_s29 + $0x90] sm:$0xff] }
  0x1a   : > { %1205 = vmatpush3.msra.mxu0 %v311_v2  ;;  %1268 = vmatpush3.msra.mxu1 %v311_v2  ;;  %v279_v12 = vld [vmem:[%s1579_s29 + $0x18] sm:$0xff]  ;;  %v280_v14 = vld [vmem:[%s1579_s29 + $0x20] sm:$0xff]  ;;  %v281_v16 = vld [vmem:[%s1579_s29 + $0x28] sm:$0xff] }
  0x1b   : > { %1206 = vmatprep.subr.mxu0 %v310_v3  ;;  %1263 = vmatprep.subr.mxu1 %v310_v3  ;;  %v295_v13 = vld [vmem:[%s1579_s29 + $0x98] sm:$0xff]  ;;  %v296_v15 = vld [vmem:[%s1579_s29 + $0xa0] sm:$0xff]  ;;  %v297_v17 = vld [vmem:[%s1579_s29 + $0xa8] sm:$0xff] }
  0x1c   : > { %1207 = vmatpush3.msra.mxu0 %v310_v3  ;;  %1269 = vmatpush3.msra.mxu1 %v310_v3  ;;  %v282_v18 = vld [vmem:[%s1579_s29 + $0x30] sm:$0xff]  ;;  %v283_v20 = vld [vmem:[%s1579_s29 + $0x38] sm:$0xff]  ;;  %v284_v22 = vld [vmem:[%s1579_s29 + $0x40] sm:$0xff] }
  0x1d   : > { %1208 = vmatprep.subr.mxu0 %v309_v4  ;;  %1264 = vmatprep.subr.mxu1 %v309_v4  ;;  %v298_v19 = vld [vmem:[%s1579_s29 + $0xb0] sm:$0xff]  ;;  %v299_v21 = vld [vmem:[%s1579_s29 + $0xb8] sm:$0xff]  ;;  %v300_v23 = vld [vmem:[%s1579_s29 + $0xc0] sm:$0xff] }
  0x1e   : > { %1209 = vmatpush3.msra.mxu0 %v309_v4  ;;  %1270 = vmatpush3.msra.mxu1 %v309_v4  ;;  %v285_v24 = vld [vmem:[%s1579_s29 + $0x48] sm:$0xff]  ;;  %v286_v26 = vld [vmem:[%s1579_s29 + $0x50] sm:$0xff]  ;;  %v287_v28 = vld [vmem:[%s1579_s29 + $0x58] sm:$0xff] }
  0x1f   : > { %1210 = vmatprep.subr.mxu0 %v308_v5  ;;  %1265 = vmatprep.subr.mxu1 %v308_v5  ;;  %v301_v25 = vld [vmem:[%s1579_s29 + $0xc8] sm:$0xff]  ;;  %v302_v27 = vld [vmem:[%s1579_s29 + $0xd0] sm:$0xff]  ;;  %v303_v29 = vld [vmem:[%s1579_s29 + $0xd8] sm:$0xff] }
  0x20   : > { %1211 = vmatpush3.msra.mxu0 %v308_v5  ;;  %1271 = vmatpush3.msra.mxu1 %v308_v5  ;;  %v288_v30 = vld [vmem:[%s1579_s29 + $0x60] sm:$0xff]  ;;  %v289_v32 = vld [vmem:[%s1579_s29 + $0x68] sm:$0xff]  ;;  %v290_v34 = vld [vmem:[%s1579_s29 + $0x70] sm:$0xff] }
  0x21   : > { %1212 = vmatprep.mubr.msk.f32.mxu0 %vm321_vm0, %v276_v6  ;;  %1236 = vmatprep.mubr.msk.f32.mxu1 %vm321_vm0, %v292_v7  ;;  %v304_v31 = vld [vmem:[%s1579_s29 + $0xe0] sm:$0xff]  ;;  %v305_v33 = vld [vmem:[%s1579_s29 + $0xe8] sm:$0xff]  ;;  %v306_v35 = vld [vmem:[%s1579_s29 + $0xf0] sm:$0xff] }
  0x22   : > { %1213 = vmatmul.mubr.msk.f32.vlgmr.msra.gmra.mxu0 %vm321_vm0, %v277_v8  ;;  %1237 = vmatmul.mubr.msk.f32.vlgmr.msra.gmra.mxu1 %vm321_vm0, %v293_v9  ;;  %v291_v36 = vld [vmem:[%s1579_s29 + $0x78] sm:$0xff] }
  0x23   : > { %1215 = vmatprep.mubr.msk.f32.mxu0 %vm321_vm0, %v278_v10  ;;  %1239 = vmatprep.mubr.msk.f32.mxu1 %vm321_vm0, %v294_v11  ;;  %v307_v37 = vld [vmem:[%s1579_s29 + $0xf8] sm:$0xff]  ;;  %s1836_s29 = scalar_lea.vmem [#allocation2], %s1118_s14 }
  0x24   : > { %s1018_s13 = sshll.u32 %s1836_s29, 4  ;;  %s2020_s13 = int_to_ptr.vmem [resolvable:$true] %s1018_s13 }
  0x25   : > { %s1393_s25 = scalar_lea.vmem %s2020_s13, 4096  ;;  %p1400_p1 = scmp.lt.s32.totalorder %s2020_s13, %s1398_s7 }
  0x26   : > { %1216 = vmatmul.mubr.msk.f32.gmra.mxu0 %vm321_vm0, %v279_v12  ;;  %1240 = vmatmul.mubr.msk.f32.gmra.mxu1 %vm321_vm0, %v295_v13  ;;  %p1394_p12 = scmp.ne.s32.totalorder %s2020_s13, %s1393_s25  ;;  %p1401_p2 = scmp.lt.s32.totalorder %s1399_s8, %s1393_s25 }
  0x27   : > { %1218 = vmatprep.mubr.msk.f32.mxu0 %vm321_vm0, %v280_v14  ;;  %1242 = vmatprep.mubr.msk.f32.mxu1 %vm321_vm0, %v296_v15 }
  0x28   : > { %p1395_p13 = pnand %p1394_p12, %p1544_p4  ;;  %p1402_p3 = por %p1401_p2, %p1400_p1 }
  0x2a   : > { %1219 = vmatmul.mubr.msk.f32.gmra.mxu0 %vm321_vm0, %v281_v16  ;;  %1243 = vmatmul.mubr.msk.f32.gmra.mxu1 %vm321_vm0, %v297_v17  ;;  %p1396_p0 = pneg %p1395_p13 }
  0x2b   : > { %1221 = vmatprep.mubr.msk.f32.mxu0 %vm321_vm0, %v282_v18  ;;  %1245 = vmatprep.mubr.msk.f32.mxu1 %vm321_vm0, %v298_v19 }
  0x2c   : > { %p1403_p5 = pnand %p1402_p3, %p1396_p0 }
  0x2e   : > { %1222 = vmatmul.mubr.msk.f32.gmra.mxu0 %vm321_vm0, %v283_v20  ;;  %1246 = vmatmul.mubr.msk.f32.gmra.mxu1 %vm321_vm0, %v299_v21 }
  0x2f   : > { %1224 = vmatprep.mubr.msk.f32.mxu0 %vm321_vm0, %v284_v22  ;;  %1248 = vmatprep.mubr.msk.f32.mxu1 %vm321_vm0, %v300_v23 }
  0x32   : > { %1225 = vmatmul.mubr.msk.f32.gmra.mxu0 %vm321_vm0, %v285_v24  ;;  %1249 = vmatmul.mubr.msk.f32.gmra.mxu1 %vm321_vm0, %v301_v25 }
  0x33   : > { %1227 = vmatprep.mubr.msk.f32.mxu0 %vm321_vm0, %v286_v26  ;;  %1251 = vmatprep.mubr.msk.f32.mxu1 %vm321_vm0, %v302_v27 }
  0x36   : > { %1228 = vmatmul.mubr.msk.f32.gmra.mxu0 %vm321_vm0, %v287_v28  ;;  %1252 = vmatmul.mubr.msk.f32.gmra.mxu1 %vm321_vm0, %v303_v29 }
  0x37   : > { %1230 = vmatprep.mubr.msk.f32.mxu0 %vm321_vm0, %v288_v30  ;;  %1254 = vmatprep.mubr.msk.f32.mxu1 %vm321_vm0, %v304_v31 }
  0x3a   : > { %1231 = vmatmul.mubr.msk.f32.gmra.mxu0 %vm321_vm0, %v289_v32  ;;  %1255 = vmatmul.mubr.msk.f32.gmra.mxu1 %vm321_vm0, %v305_v33 }
  0x3b   : > { %1233 = vmatprep.mubr.msk.f32.mxu0 %vm321_vm0, %v290_v34  ;;  %1257 = vmatprep.mubr.msk.f32.mxu1 %vm321_vm0, %v306_v35 }
  0x3e   : > { %1234 = vmatmul.mubr.msk.f32.gmra.mxu0 %vm321_vm0, %v291_v36  ;;  %1258 = vmatmul.mubr.msk.f32.gmra.mxu1 %vm321_vm0, %v307_v37 }
  0xe2   : > { %v1214_v39 = vpop.f32.mrf.mxu0  ;;  %v1238_v40 = vpop.f32.mrf.mxu1 }
  0xe3   : > { %v1654_v41 = vadd.f32 %v1214_v39, %v1651_v38  ;;  %v1657_v42 = vadd.f32 %v1238_v40, %v1651_v38 }
  0xe4   : > { %v484_v43 = vpop.f32.mrf.mxu0  ;;  %v564_v44 = vpop.f32.mrf.mxu1 }
  0xe5   : > { %v1660_v45 = vadd.f32 %v1651_v38, %v484_v43  ;;  %v660_v46 = vmul.f32 %v1657_v42, %v1657_v42  ;;  %v644_v47 = vmul.f32 %v1654_v41, %v1654_v41  ;;  %v1673_v53 = vadd.f32 %v1651_v38, %v564_v44 }
  0xe6   : > { %v1217_v48 = vpop.f32.mrf.mxu0  ;;  %v1241_v49 = vpop.f32.mrf.mxu1 }
  0xe7   : > { %v1667_v50 = vadd.f32 %v1217_v48, %v1651_v38  ;;  %709 = vadd.xlane.f32.xlu1 %v660_v46  ;;  %677 = vadd.xlane.f32.xlu0 %v644_v47  ;;  %v1670_v51 = vadd.f32 %v1241_v49, %v1651_v38  ;;  %v643_v55 = vmul.f32 %v1660_v45, %v1660_v45 }
  0xe8   : > { %v494_v52 = vpop.f32.mrf.mxu0  ;;  %v574_v56 = vpop.f32.mrf.mxu1  ;;  %v659_v61 = vmul.f32 %v1673_v53, %v1673_v53 }
  0xe9   : > { %v646_v54 = vmul.f32 %v1667_v50, %v1667_v50  ;;  %v662_v58 = vmul.f32 %v1670_v51, %v1670_v51  ;;  %v1682_v59 = vadd.f32 %v1651_v38, %v494_v52  ;;  %v1685_v60 = vadd.f32 %v1651_v38, %v574_v56 }
  0xea   : > { %v1220_v57 = vpop.f32.mrf.mxu0  ;;  %v1244_v63 = vpop.f32.mrf.mxu1 }
  0xeb   : > { %681 = vadd.xlane.f32.xlu1 %v646_v54  ;;  %675 = vadd.xlane.f32.xlu0 %v643_v55  ;;  %v1690_v0 = vadd.f32 %v1220_v57, %v1651_v38  ;;  %v645_v2 = vmul.f32 %v1682_v59, %v1682_v59  ;;  %v661_v3 = vmul.f32 %v1685_v60, %v1685_v60 }
  0xec   : > { %v504_v62 = vpop.f32.mrf.mxu0  ;;  %v584_v4 = vpop.f32.mrf.mxu1  ;;  %v1700_v6 = vadd.f32 %v1244_v63, %v1651_v38 }
  0xed   : > { %v1693_v1 = vadd.f32 %v1651_v38, %v504_v62  ;;  %v1703_v7 = vadd.f32 %v1651_v38, %v584_v4  ;;  %v648_v8 = vmul.f32 %v1690_v0, %v1690_v0 }
  0xee   : > { %v1223_v5 = vpop.f32.mrf.mxu0  ;;  %v1247_v11 = vpop.f32.mrf.mxu1  ;;  %v664_v14 = vmul.f32 %v1700_v6, %v1700_v6 }
  0xef   : > { %713 = vadd.xlane.f32.xlu1 %v662_v58  ;;  %707 = vadd.xlane.f32.xlu0 %v659_v61  ;;  %v647_v9 = vmul.f32 %v1693_v1, %v1693_v1  ;;  %v1710_v12 = vadd.f32 %v1223_v5, %v1651_v38  ;;  %v663_v15 = vmul.f32 %v1703_v7, %v1703_v7 }
  0xf0   : > { %v514_v10 = vpop.f32.mrf.mxu0  ;;  %v594_v16 = vpop.f32.mrf.mxu1  ;;  %v1720_v18 = vadd.f32 %v1247_v11, %v1651_v38 }
  0xf1   : > { %v1713_v13 = vadd.f32 %v1651_v38, %v514_v10  ;;  %v1723_v19 = vadd.f32 %v1651_v38, %v594_v16  ;;  %v650_v20 = vmul.f32 %v1710_v12, %v1710_v12 }
  0xf2   : > { %v1226_v17 = vpop.f32.mrf.mxu0  ;;  %v1250_v23 = vpop.f32.mrf.mxu1  ;;  %v666_v26 = vmul.f32 %v1720_v18, %v1720_v18 }
  0xf3   : > { %679 = vadd.xlane.f32.xlu1 %v645_v2  ;;  %711 = vadd.xlane.f32.xlu0 %v661_v3  ;;  %v649_v21 = vmul.f32 %v1713_v13, %v1713_v13  ;;  %v1730_v24 = vadd.f32 %v1226_v17, %v1651_v38  ;;  %v665_v27 = vmul.f32 %v1723_v19, %v1723_v19 }
  0xf4   : > { %v524_v22 = vpop.f32.mrf.mxu0  ;;  %v604_v28 = vpop.f32.mrf.mxu1  ;;  %v1740_v30 = vadd.f32 %v1250_v23, %v1651_v38 }
  0xf5   : > { %v1733_v25 = vadd.f32 %v1651_v38, %v524_v22  ;;  %v1743_v31 = vadd.f32 %v1651_v38, %v604_v28  ;;  %v652_v32 = vmul.f32 %v1730_v24, %v1730_v24 }
  0xf6   : > { %v1229_v29 = vpop.f32.mrf.mxu0  ;;  %v1253_v35 = vpop.f32.mrf.mxu1  ;;  %v668_v39 = vmul.f32 %v1740_v30, %v1740_v30 }
  0xf7   : > { %685 = vadd.xlane.f32.xlu1 %v648_v8  ;;  %683 = vadd.xlane.f32.xlu0 %v647_v9  ;;  %v651_v33 = vmul.f32 %v1733_v25, %v1733_v25  ;;  %v1750_v36 = vadd.f32 %v1229_v29, %v1651_v38  ;;  %v667_v40 = vmul.f32 %v1743_v31, %v1743_v31 }
  0xf8   : > { %v534_v34 = vpop.f32.mrf.mxu0  ;;  %v614_v43 = vpop.f32.mrf.mxu1  ;;  %v1760_v46 = vadd.f32 %v1253_v35, %v1651_v38 }
  0xf9   : > { %v1753_v37 = vadd.f32 %v1651_v38, %v534_v34  ;;  %v1763_v47 = vadd.f32 %v1651_v38, %v614_v43  ;;  %v654_v48 = vmul.f32 %v1750_v36, %v1750_v36 }
  0xfa   : > { %v1232_v44 = vpop.f32.mrf.mxu0  ;;  %v1256_v54 = vpop.f32.mrf.mxu1  ;;  %v670_v57 = vmul.f32 %v1760_v46, %v1760_v46 }
  0xfb   : > { %717 = vadd.xlane.f32.xlu1 %v664_v14  ;;  %715 = vadd.xlane.f32.xlu0 %v663_v15  ;;  %v653_v49 = vmul.f32 %v1753_v37, %v1753_v37  ;;  %v1770_v55 = vadd.f32 %v1232_v44, %v1651_v38  ;;  %v669_v58 = vmul.f32 %v1763_v47, %v1763_v47 }
  0xfc   : > { %v544_v52 = vpop.f32.mrf.mxu0  ;;  %v624_v61 = vpop.f32.mrf.mxu1  ;;  %v1780_v63 = vadd.f32 %v1256_v54, %v1651_v38 }
  0xfd   : > { %v1773_v56 = vadd.f32 %v1651_v38, %v544_v52  ;;  %v1783_v2 = vadd.f32 %v1651_v38, %v624_v61  ;;  %v656_v3 = vmul.f32 %v1770_v55, %v1770_v55 }
  0xfe   : > { %v1235_v62 = vpop.f32.mrf.mxu0  ;;  %v1259_v8 = vpop.f32.mrf.mxu1  ;;  %v672_v11 = vmul.f32 %v1780_v63, %v1780_v63 }
  0xff   : > { %689 = vadd.xlane.f32.xlu1 %v650_v20  ;;  %687 = vadd.xlane.f32.xlu0 %v649_v21  ;;  %v655_v4 = vmul.f32 %v1773_v56, %v1773_v56  ;;  %v1790_v9 = vadd.f32 %v1235_v62, %v1651_v38  ;;  %v671_v14 = vmul.f32 %v1783_v2, %v1783_v2 }
 0x100   : > { %v554_v5 = vpop.f32.mrf.mxu0  ;;  %v634_v15 = vpop.f32.mrf.mxu1  ;;  %v1800_v16 = vadd.f32 %v1259_v8, %v1651_v38 }
 0x101   : > { %v1793_v10 = vadd.f32 %v1651_v38, %v554_v5  ;;  %v1803_v17 = vadd.f32 %v1651_v38, %v634_v15  ;;  %v658_v20 = vmul.f32 %v1790_v9, %v1790_v9 }
 0x102   : > { %v674_v22 = vmul.f32 %v1800_v16, %v1800_v16 }
 0x103   : > { %721 = vadd.xlane.f32.xlu1 %v666_v26  ;;  %719 = vadd.xlane.f32.xlu0 %v665_v27  ;;  %v657_v21 = vmul.f32 %v1793_v10, %v1793_v10  ;;  %v673_v23 = vmul.f32 %v1803_v17, %v1803_v17 }
 0x107   : > { %693 = vadd.xlane.f32.xlu1 %v652_v32  ;;  %691 = vadd.xlane.f32.xlu0 %v651_v33 }
 0x10b   : > { %725 = vadd.xlane.f32.xlu1 %v668_v39  ;;  %723 = vadd.xlane.f32.xlu0 %v667_v40 }
 0x10f   : > { %697 = vadd.xlane.f32.xlu1 %v654_v48  ;;  %695 = vadd.xlane.f32.xlu0 %v653_v49 }
 0x113   : > { %729 = vadd.xlane.f32.xlu1 %v670_v57  ;;  %727 = vadd.xlane.f32.xlu0 %v669_v58 }
 0x117   : > { %701 = vadd.xlane.f32.xlu1 %v656_v3  ;;  %699 = vadd.xlane.f32.xlu0 %v655_v4 }
 0x11b   : > { %733 = vadd.xlane.f32.xlu1 %v672_v11  ;;  %731 = vadd.xlane.f32.xlu0 %v671_v14 }
 0x11f   : > { %705 = vadd.xlane.f32.xlu1 %v658_v20  ;;  %703 = vadd.xlane.f32.xlu0 %v657_v21  ;;  %v1817_v21 = vld [vmem:[%s2074_s3] ss:$0 sm:$0xff] }
 0x123   : > { %737 = vadd.xlane.f32.xlu1 %v674_v22  ;;  %735 = vadd.xlane.f32.xlu0 %v673_v23 }
 0x170   : > { %v710_v26 = vpop.xlane.xlu1 %709  ;;  %v678_v27 = vpop.xlane.xlu0 %677 }
 0x171   : > { %v756_v38 = vmul.f32 0.0078125, %v710_v26  ;;  %v740_v28 = vmul.f32 0.0078125, %v678_v27 }
 0x173   : > { %v788_v29 = vadd.f32 1e-05, %v756_v38  ;;  %v772_v32 = vadd.f32 1e-05, %v740_v28  ;;  %v923_v38 = vld [vmem:[%s2075_s4 + $0x88] sm:$0xff] }
 0x174   : > { %v682_v33 = vpop.xlane.xlu1 %681  ;;  %v676_v34 = vpop.xlane.xlu0 %675 }
 0x175   : > { %1329 = vrsqrt.f32 %v788_v29  ;;  %v742_v35 = vmul.f32 0.0078125, %v682_v33  ;;  %v739_v39 = vmul.f32 0.0078125, %v676_v34  ;;  %v907_v34 = vld [vmem:[%s2075_s4 + $0x8] sm:$0xff] }
 0x176   : > { %1331 = vrsqrt.f32 %v772_v32 }
 0x177   : > { %v774_v40 = vadd.f32 1e-05, %v742_v35  ;;  %v771_v43 = vadd.f32 1e-05, %v739_v39 }
 0x178   : > { %v714_v44 = vpop.xlane.xlu1 %713  ;;  %v708_v48 = vpop.xlane.xlu0 %707 }
 0x179   : > { %1333 = vrsqrt.f32 %v774_v40  ;;  %v758_v49 = vmul.f32 0.0078125, %v714_v44  ;;  %v755_v52 = vmul.f32 0.0078125, %v708_v48 }
 0x17a   : > { %1335 = vrsqrt.f32 %v771_v43 }
 0x17b   : > { %v790_v54 = vadd.f32 1e-05, %v758_v49  ;;  %v787_v57 = vadd.f32 1e-05, %v755_v52 }
 0x17c   : > { %v680_v58 = vpop.xlane.xlu1 %679  ;;  %v712_v61 = vpop.xlane.xlu0 %711 }
 0x17d   : > { %1337 = vrsqrt.f32 %v790_v54  ;;  %v741_v62 = vmul.f32 0.0078125, %v680_v58  ;;  %v757_v3 = vmul.f32 0.0078125, %v712_v61  ;;  %v909_v54 = vld [vmem:[%s2075_s4 + $0x18] sm:$0xff] }
 0x17e   : > { %1339 = vrsqrt.f32 %v787_v57 }
 0x17f   : > { %v773_v4 = vadd.f32 1e-05, %v741_v62  ;;  %v789_v5 = vadd.f32 1e-05, %v757_v3 }
 0x180   : > { %v686_v8 = vpop.xlane.xlu1 %685  ;;  %v684_v11 = vpop.xlane.xlu0 %683 }
 0x181   : > { %1341 = vrsqrt.f32 %v773_v4  ;;  %v744_v14 = vmul.f32 0.0078125, %v686_v8  ;;  %v743_v15 = vmul.f32 0.0078125, %v684_v11 }
 0x182   : > { %v1330_v20 = vpop.eup %1329  ;;  %1343 = vrsqrt.f32 %v789_v5 }
 0x183   : > { %v1332_v22 = vpop.eup %1331  ;;  %v852_v23 = vmul.f32 %v1330_v20, %v1657_v42  ;;  %v776_v26 = vadd.f32 1e-05, %v744_v14  ;;  %v775_v27 = vadd.f32 1e-05, %v743_v15 }
 0x184   : > { %v836_v28 = vmul.f32 %v1332_v22, %v1654_v41  ;;  %v718_v29 = vpop.xlane.xlu1 %717  ;;  %v716_v32 = vpop.xlane.xlu0 %715 }
 0x185   : > { %v891_v33 = vmul.f32 %v1817_v21, %v852_v23  ;;  %1345 = vrsqrt.f32 %v776_v26  ;;  %v760_v35 = vmul.f32 0.0078125, %v718_v29  ;;  %v759_v39 = vmul.f32 0.0078125, %v716_v32  ;;  %v925_v23 = vld [vmem:[%s2075_s4 + $0x98] sm:$0xff]  ;;  %v922_v29 = vld [vmem:[%s2075_s4 + $0x80] sm:$0xff] }
 0x186   : > { %v1334_v42 = vpop.eup %1333  ;;  %v875_v40 = vmul.f32 %v1817_v21, %v836_v28  ;;  %1347 = vrsqrt.f32 %v775_v27 }
 0x187   : > { %v1336_v43 = vpop.eup %1335  ;;  %v955_v44 = vadd.f32 %v923_v38, %v891_v33  ;;  %v838_v48 = vmul.f32 %v1334_v42, %v1667_v50  ;;  %v792_v41 = vadd.f32 1e-05, %v760_v35  ;;  %v791_v49 = vadd.f32 1e-05, %v759_v39  ;;  %v906_v50 = vld [vmem:[%s2075_s4] sm:$0xff] }
 0x188   : > { %v939_v52 = vadd.f32 %v907_v34, %v875_v40  ;;  %v835_v57 = vmul.f32 %v1336_v43, %v1660_v45  ;;  %v690_v58 = vpop.xlane.xlu1 %689  ;;  %v688_v61 = vpop.xlane.xlu0 %687 }
 0x189   : > { %987 = vst [vmem:[%s1836_s29 + $0x88] sm:$0xff] %v955_v44  ;;  %v877_v62 = vmul.f32 %v1817_v21, %v838_v48  ;;  %1349 = vrsqrt.f32 %v792_v41  ;;  %v746_v3 = vmul.f32 0.0078125, %v690_v58  ;;  %v745_v4 = vmul.f32 0.0078125, %v688_v61  ;;  %v908_v44 = vld [vmem:[%s2075_s4 + $0x10] sm:$0xff] }
 0x18a   : > { %v1338_v5 = vpop.eup %1337  ;;  %971 = vst [vmem:[%s1836_s29 + $0x8] sm:$0xff] %v939_v52  ;;  %v874_v45 = vmul.f32 %v1817_v21, %v835_v57  ;;  %1351 = vrsqrt.f32 %v791_v49 }
 0x18b   : > { %v1340_v8 = vpop.eup %1339  ;;  %v941_v11 = vadd.f32 %v909_v54, %v877_v62  ;;  %v854_v14 = vmul.f32 %v1338_v5, %v1670_v51  ;;  %v778_v15 = vadd.f32 1e-05, %v746_v3  ;;  %v777_v20 = vadd.f32 1e-05, %v745_v4  ;;  %v924_v54 = vld [vmem:[%s2075_s4 + $0x90] sm:$0xff] }
 0x18c   : > { %v938_v22 = vadd.f32 %v906_v50, %v874_v45  ;;  %v851_v26 = vmul.f32 %v1340_v8, %v1673_v53  ;;  %v722_v27 = vpop.xlane.xlu1 %721  ;;  %v720_v38 = vpop.xlane.xlu0 %719  ;;  %v911_v45 = vld [vmem:[%s2075_s4 + $0x28] sm:$0xff] }
 0x18d   : > { %973 = vst [vmem:[%s1836_s29 + $0x18] sm:$0xff] %v941_v11  ;;  %v893_v28 = vmul.f32 %v1817_v21, %v854_v14  ;;  %1353 = vrsqrt.f32 %v778_v15  ;;  %v762_v51 = vmul.f32 0.0078125, %v722_v27  ;;  %v761_v32 = vmul.f32 0.0078125, %v720_v38 }
 0x18e   : > { %v1342_v33 = vpop.eup %1341  ;;  %970 = vst [vmem:[%s1836_s29] sm:$0xff] %v938_v22  ;;  %v890_v34 = vmul.f32 %v1817_v21, %v851_v26  ;;  %1355 = vrsqrt.f32 %v777_v20  ;;  %v910_v20 = vld [vmem:[%s2075_s4 + $0x20] sm:$0xff] }
 0x18f   : > { %v1344_v35 = vpop.eup %1343  ;;  %v957_v53 = vadd.f32 %v925_v23, %v893_v28  ;;  %v837_v39 = vmul.f32 %v1342_v33, %v1682_v59  ;;  %v794_v42 = vadd.f32 1e-05, %v762_v51  ;;  %v793_v40 = vadd.f32 1e-05, %v761_v32  ;;  %v927_v32 = vld [vmem:[%s2075_s4 + $0xa8] sm:$0xff] }
 0x190   : > { %v954_v43 = vadd.f32 %v922_v29, %v890_v34  ;;  %v853_v48 = vmul.f32 %v1344_v35, %v1685_v60  ;;  %v694_v41 = vpop.xlane.xlu1 %693  ;;  %v692_v49 = vpop.xlane.xlu0 %691 }
 0x191   : > { %989 = vst [vmem:[%s1836_s29 + $0x98] sm:$0xff] %v957_v53  ;;  %v876_v52 = vmul.f32 %v1817_v21, %v837_v39  ;;  %1357 = vrsqrt.f32 %v794_v42  ;;  %v748_v59 = vmul.f32 0.0078125, %v694_v41  ;;  %v747_v57 = vmul.f32 0.0078125, %v692_v49  ;;  %v926_v39 = vld [vmem:[%s2075_s4 + $0xa0] sm:$0xff] }
 0x192   : > { %v1346_v58 = vpop.eup %1345  ;;  %986 = vst [vmem:[%s1836_s29 + $0x80] sm:$0xff] %v954_v43  ;;  %v892_v61 = vmul.f32 %v1817_v21, %v853_v48  ;;  %1359 = vrsqrt.f32 %v793_v40 }
 0x193   : > { %v1348_v62 = vpop.eup %1347  ;;  %v940_v60 = vadd.f32 %v908_v44, %v876_v52  ;;  %v840_v50 = vmul.f32 %v1346_v58, %v1690_v0  ;;  %v780_v3 = vadd.f32 1e-05, %v748_v59  ;;  %v779_v4 = vadd.f32 1e-05, %v747_v57 }
 0x194   : > { %v956_v5 = vadd.f32 %v924_v54, %v892_v61  ;;  %v839_v8 = vmul.f32 %v1348_v62, %v1693_v1  ;;  %v726_v11 = vpop.xlane.xlu1 %725  ;;  %v724_v14 = vpop.xlane.xlu0 %723  ;;  %v913_v54 = vld [vmem:[%s2075_s4 + $0x38] sm:$0xff]  ;;  %v912_v62 = vld [vmem:[%s2075_s4 + $0x30] sm:$0xff] }
 0x195   : > { %972 = vst [vmem:[%s1836_s29 + $0x10] sm:$0xff] %v940_v60  ;;  %v879_v15 = vmul.f32 %v1817_v21, %v840_v50  ;;  %1361 = vrsqrt.f32 %v780_v3  ;;  %v764_v0 = vmul.f32 0.0078125, %v726_v11  ;;  %v763_v22 = vmul.f32 0.0078125, %v724_v14  ;;  %v929_v14 = vld [vmem:[%s2075_s4 + $0xb8] sm:$0xff] }
 0x196   : > { %v1350_v23 = vpop.eup %1349  ;;  %988 = vst [vmem:[%s1836_s29 + $0x90] sm:$0xff] %v956_v5  ;;  %v878_v26 = vmul.f32 %v1817_v21, %v839_v8  ;;  %1363 = vrsqrt.f32 %v779_v4 }
 0x197   : > { %v1352_v27 = vpop.eup %1351  ;;  %v943_v1 = vadd.f32 %v911_v45, %v879_v15  ;;  %v856_v38 = vmul.f32 %v1350_v23, %v1700_v6  ;;  %v796_v28 = vadd.f32 1e-05, %v764_v0  ;;  %v795_v29 = vadd.f32 1e-05, %v763_v22  ;;  %v928_v23 = vld [vmem:[%s2075_s4 + $0xb0] sm:$0xff] }
 0x198   : > { %v942_v51 = vadd.f32 %v910_v20, %v878_v26  ;;  %v855_v33 = vmul.f32 %v1352_v27, %v1703_v7  ;;  %v698_v34 = vpop.xlane.xlu1 %697  ;;  %v696_v35 = vpop.xlane.xlu0 %695 }
 0x199   : > { %975 = vst [vmem:[%s1836_s29 + $0x28] sm:$0xff] %v943_v1  ;;  %v895_v53 = vmul.f32 %v1817_v21, %v856_v38  ;;  %1365 = vrsqrt.f32 %v796_v28  ;;  %v750_v6 = vmul.f32 0.0078125, %v698_v34  ;;  %v749_v42 = vmul.f32 0.0078125, %v696_v35 }
 0x19a   : > { %v1354_v40 = vpop.eup %1353  ;;  %974 = vst [vmem:[%s1836_s29 + $0x20] sm:$0xff] %v942_v51  ;;  %v894_v43 = vmul.f32 %v1817_v21, %v855_v33  ;;  %1367 = vrsqrt.f32 %v795_v29  ;;  %v915_v33 = vld [vmem:[%s2075_s4 + $0x48] sm:$0xff] }
 0x19b   : > { %v1356_v44 = vpop.eup %1355  ;;  %v959_v7 = vadd.f32 %v927_v32, %v895_v53  ;;  %v842_v48 = vmul.f32 %v1354_v40, %v1710_v12  ;;  %v782_v41 = vadd.f32 1e-05, %v750_v6  ;;  %v781_v49 = vadd.f32 1e-05, %v749_v42  ;;  %v914_v6 = vld [vmem:[%s2075_s4 + $0x40] sm:$0xff] }
 0x19c   : > { %v958_v52 = vadd.f32 %v926_v39, %v894_v43  ;;  %v841_v59 = vmul.f32 %v1356_v44, %v1713_v13  ;;  %v730_v57 = vpop.xlane.xlu1 %729  ;;  %v728_v58 = vpop.xlane.xlu0 %727 }
 0x19d   : > { %991 = vst [vmem:[%s1836_s29 + $0xa8] sm:$0xff] %v959_v7  ;;  %v881_v61 = vmul.f32 %v1817_v21, %v842_v48  ;;  %1369 = vrsqrt.f32 %v782_v41  ;;  %v766_v12 = vmul.f32 0.0078125, %v730_v57  ;;  %v765_v60 = vmul.f32 0.0078125, %v728_v58 }
 0x19e   : > { %v1358_v50 = vpop.eup %1357  ;;  %990 = vst [vmem:[%s1836_s29 + $0xa0] sm:$0xff] %v958_v52  ;;  %v880_v3 = vmul.f32 %v1817_v21, %v841_v59  ;;  %1371 = vrsqrt.f32 %v781_v49  ;;  %v931_v52 = vld [vmem:[%s2075_s4 + $0xc8] sm:$0xff] }
 0x19f   : > { %v1360_v4 = vpop.eup %1359  ;;  %v945_v13 = vadd.f32 %v913_v54, %v881_v61  ;;  %v858_v5 = vmul.f32 %v1358_v50, %v1720_v18  ;;  %v798_v45 = vadd.f32 1e-05, %v766_v12  ;;  %v797_v8 = vadd.f32 1e-05, %v765_v60  ;;  %v930_v61 = vld [vmem:[%s2075_s4 + $0xc0] sm:$0xff] }
 0x1a0   : > { %v944_v11 = vadd.f32 %v912_v62, %v880_v3  ;;  %v857_v15 = vmul.f32 %v1360_v4, %v1723_v19  ;;  %v702_v20 = vpop.xlane.xlu1 %701  ;;  %v700_v0 = vpop.xlane.xlu0 %699 }
 0x1a1   : > { %977 = vst [vmem:[%s1836_s29 + $0x38] sm:$0xff] %v945_v13  ;;  %v897_v22 = vmul.f32 %v1817_v21, %v858_v5  ;;  %1373 = vrsqrt.f32 %v798_v45  ;;  %v752_v18 = vmul.f32 0.0078125, %v702_v20  ;;  %v751_v26 = vmul.f32 0.0078125, %v700_v0  ;;  %v917_v45 = vld [vmem:[%s2075_s4 + $0x58] sm:$0xff]  ;;  %v916_v20 = vld [vmem:[%s2075_s4 + $0x50] sm:$0xff] }
 0x1a2   : > { %v1362_v27 = vpop.eup %1361  ;;  %976 = vst [vmem:[%s1836_s29 + $0x30] sm:$0xff] %v944_v11  ;;  %v896_v1 = vmul.f32 %v1817_v21, %v857_v15  ;;  %1375 = vrsqrt.f32 %v797_v8 }
 0x1a3   : > { %v1364_v38 = vpop.eup %1363  ;;  %v961_v19 = vadd.f32 %v929_v14, %v897_v22  ;;  %v844_v28 = vmul.f32 %v1362_v27, %v1730_v24  ;;  %v784_v29 = vadd.f32 1e-05, %v752_v18  ;;  %v783_v51 = vadd.f32 1e-05, %v751_v26 }
 0x1a4   : > { %v960_v32 = vadd.f32 %v928_v23, %v896_v1  ;;  %v843_v34 = vmul.f32 %v1364_v38, %v1733_v25  ;;  %v734_v35 = vpop.xlane.xlu1 %733  ;;  %v732_v53 = vpop.xlane.xlu0 %731 }
 0x1a5   : > { %993 = vst [vmem:[%s1836_s29 + $0xb8] sm:$0xff] %v961_v19  ;;  %v883_v39 = vmul.f32 %v1817_v21, %v844_v28  ;;  %1377 = vrsqrt.f32 %v784_v29  ;;  %v768_v24 = vmul.f32 0.0078125, %v734_v35  ;;  %v767_v42 = vmul.f32 0.0078125, %v732_v53  ;;  %v933_v19 = vld [vmem:[%s2075_s4 + $0xd8] sm:$0xff]  ;;  %v919_v53 = vld [vmem:[%s2075_s4 + $0x68] sm:$0xff] }
 0x1a6   : > { %v1366_v40 = vpop.eup %1365  ;;  %992 = vst [vmem:[%s1836_s29 + $0xb0] sm:$0xff] %v960_v32  ;;  %v882_v43 = vmul.f32 %v1817_v21, %v843_v34  ;;  %1379 = vrsqrt.f32 %v783_v51  ;;  %v932_v51 = vld [vmem:[%s2075_s4 + $0xd0] sm:$0xff] }
 0x1a7   : > { %v1368_v44 = vpop.eup %1367  ;;  %v947_v25 = vadd.f32 %v915_v33, %v883_v39  ;;  %v860_v7 = vmul.f32 %v1366_v40, %v1740_v30  ;;  %v800_v48 = vadd.f32 1e-05, %v768_v24  ;;  %v799_v41 = vadd.f32 1e-05, %v767_v42  ;;  %v918_v24 = vld [vmem:[%s2075_s4 + $0x60] sm:$0xff] }
 0x1a8   : > { %v946_v49 = vadd.f32 %v914_v6, %v882_v43  ;;  %v859_v54 = vmul.f32 %v1368_v44, %v1743_v31  ;;  %v706_v59 = vpop.xlane.xlu1 %705  ;;  %v704_v57 = vpop.xlane.xlu0 %703 }
 0x1a9   : > { %979 = vst [vmem:[%s1836_s29 + $0x48] sm:$0xff] %v947_v25  ;;  %v899_v58 = vmul.f32 %v1817_v21, %v860_v7  ;;  %1381 = vrsqrt.f32 %v800_v48  ;;  %v754_v30 = vmul.f32 0.0078125, %v706_v59  ;;  %v753_v62 = vmul.f32 0.0078125, %v704_v57 }
 0x1aa   : > { %v1370_v12 = vpop.eup %1369  ;;  %978 = vst [vmem:[%s1836_s29 + $0x40] sm:$0xff] %v946_v49  ;;  %v898_v60 = vmul.f32 %v1817_v21, %v859_v54  ;;  %1383 = vrsqrt.f32 %v799_v41  ;;  %v934_v41 = vld [vmem:[%s2075_s4 + $0xe0] sm:$0xff] }
 0x1ab   : > { %v1372_v50 = vpop.eup %1371  ;;  %v963_v31 = vadd.f32 %v931_v52, %v899_v58  ;;  %v846_v3 = vmul.f32 %v1370_v12, %v1750_v36  ;;  %v786_v4 = vadd.f32 1e-05, %v754_v30  ;;  %v785_v13 = vadd.f32 1e-05, %v753_v62  ;;  %v920_v30 = vld [vmem:[%s2075_s4 + $0x70] sm:$0xff] }
 0x1ac   : > { %v962_v5 = vadd.f32 %v930_v61, %v898_v60  ;;  %v845_v8 = vmul.f32 %v1372_v50, %v1753_v37  ;;  %v738_v11 = vpop.xlane.xlu1 %737  ;;  %v736_v14 = vpop.xlane.xlu0 %735 }
 0x1ad   : > { %995 = vst [vmem:[%s1836_s29 + $0xc8] sm:$0xff] %v963_v31  ;;  %v885_v15 = vmul.f32 %v1817_v21, %v846_v3  ;;  %1385 = vrsqrt.f32 %v786_v4  ;;  %v770_v36 = vmul.f32 0.0078125, %v738_v11  ;;  %v769_v0 = vmul.f32 0.0078125, %v736_v14 }
 0x1ae   : > { %v1374_v22 = vpop.eup %1373  ;;  %994 = vst [vmem:[%s1836_s29 + $0xc0] sm:$0xff] %v962_v5  ;;  %v884_v23 = vmul.f32 %v1817_v21, %v845_v8  ;;  %1387 = vrsqrt.f32 %v785_v13  ;;  %v936_v13 = vld [vmem:[%s2075_s4 + $0xf0] sm:$0xff] }
 0x1af   : > { %v1376_v37 = vpop.eup %1375  ;;  %v949_v18 = vadd.f32 %v917_v45, %v885_v15  ;;  %v862_v26 = vmul.f32 %v1374_v22, %v1760_v46  ;;  %v802_v27 = vadd.f32 1e-05, %v770_v36  ;;  %v801_v1 = vadd.f32 1e-05, %v769_v0 }
 0x1b0   : > { %v948_v38 = vadd.f32 %v916_v20, %v884_v23  ;;  %v861_v28 = vmul.f32 %v1376_v37, %v1763_v47 }
 0x1b1   : > { %981 = vst [vmem:[%s1836_s29 + $0x58] sm:$0xff] %v949_v18  ;;  %v901_v29 = vmul.f32 %v1817_v21, %v862_v26  ;;  %1389 = vrsqrt.f32 %v802_v27 }
 0x1b2   : > { %v1378_v46 = vpop.eup %1377  ;;  %980 = vst [vmem:[%s1836_s29 + $0x50] sm:$0xff] %v948_v38  ;;  %v900_v32 = vmul.f32 %v1817_v21, %v861_v28  ;;  %1391 = vrsqrt.f32 %v801_v1 }
 0x1b3   : > { %v1380_v33 = vpop.eup %1379  ;;  %v965_v34 = vadd.f32 %v933_v19, %v901_v29  ;;  %v848_v35 = vmul.f32 %v1378_v46, %v1770_v55 }
 0x1b4   : > { %v964_v47 = vadd.f32 %v932_v51, %v900_v32  ;;  %v847_v39 = vmul.f32 %v1380_v33, %v1773_v56  ;;  %v935_v56 = vld [vmem:[%s2075_s4 + $0xe8] sm:$0xff] }
 0x1b5   : > { %997 = vst [vmem:[%s1836_s29 + $0xd8] sm:$0xff] %v965_v34  ;;  %v887_v6 = vmul.f32 %v1817_v21, %v848_v35 }
 0x1b6   : > { %v1382_v42 = vpop.eup %1381  ;;  %996 = vst [vmem:[%s1836_s29 + $0xd0] sm:$0xff] %v964_v47  ;;  %v886_v55 = vmul.f32 %v1817_v21, %v847_v39 }
 0x1b7   : > { %v1384_v40 = vpop.eup %1383  ;;  %v951_v43 = vadd.f32 %v919_v53, %v887_v6  ;;  %v864_v44 = vmul.f32 %v1382_v42, %v1780_v63 }
 0x1b8   : > { %v950_v25 = vadd.f32 %v918_v24, %v886_v55  ;;  %v863_v7 = vmul.f32 %v1384_v40, %v1783_v2  ;;  %v921_v2 = vld [vmem:[%s2075_s4 + $0x78] sm:$0xff] }
 0x1b9   : > { %983 = vst [vmem:[%s1836_s29 + $0x68] sm:$0xff] %v951_v43  ;;  %v903_v48 = vmul.f32 %v1817_v21, %v864_v44 }
 0x1ba   : > { %v1386_v49 = vpop.eup %1385  ;;  %982 = vst [vmem:[%s1836_s29 + $0x60] sm:$0xff] %v950_v25  ;;  %v902_v63 = vmul.f32 %v1817_v21, %v863_v7 }
 0x1bb   : > { %v1388_v52 = vpop.eup %1387  ;;  %v967_v54 = vadd.f32 %v935_v56, %v903_v48  ;;  %v850_v59 = vmul.f32 %v1386_v49, %v1790_v9 }
 0x1bc   : > { %v966_v57 = vadd.f32 %v934_v41, %v902_v63  ;;  %v849_v58 = vmul.f32 %v1388_v52, %v1793_v10  ;;  %v937_v10 = vld [vmem:[%s2075_s4 + $0xf8] sm:$0xff] }
 0x1bd   : > { %999 = vst [vmem:[%s1836_s29 + $0xe8] sm:$0xff] %v967_v54  ;;  %v889_v61 = vmul.f32 %v1817_v21, %v850_v59 }
 0x1be   : > { %v1390_v62 = vpop.eup %1389  ;;  %998 = vst [vmem:[%s1836_s29 + $0xe0] sm:$0xff] %v966_v57  ;;  %v888_v9 = vmul.f32 %v1817_v21, %v849_v58 }
 0x1bf   : > { %v1392_v12 = vpop.eup %1391  ;;  %v953_v60 = vadd.f32 %v921_v2, %v889_v61  ;;  %v866_v50 = vmul.f32 %v1390_v62, %v1800_v16 }
 0x1c0   : > { %v952_v31 = vadd.f32 %v920_v30, %v888_v9  ;;  %v865_v3 = vmul.f32 %v1392_v12, %v1803_v17 }
 0x1c1   : > { %985 = vst [vmem:[%s1836_s29 + $0x78] sm:$0xff] %v953_v60  ;;  %v905_v4 = vmul.f32 %v1817_v21, %v866_v50 }
 0x1c2   : > { %984 = vst [vmem:[%s1836_s29 + $0x70] sm:$0xff] %v952_v31  ;;  %v904_v16 = vmul.f32 %v1817_v21, %v865_v3 }
 0x1c3   : > { %v969_v5 = vadd.f32 %v937_v10, %v905_v4 }
 0x1c4   : > { %v968_v17 = vadd.f32 %v936_v13, %v904_v16 }
 0x1c5   : > { %1001 = vst [vmem:[%s1836_s29 + $0xf8] sm:$0xff] %v969_v5 }
 0x1c6   : > { %1000 = vst [vmem:[%s1836_s29 + $0xf0] sm:$0xff] %v968_v17 }
 0x1c7   : > { %1406 = shalt.err (!%p1403_p5)
}
 0x1c8   : > { %s1407_s11 = scalar_lea.hbm %s2018_s24, 4096  ;;  %s1411_s10 = scalar_lea.hbm %s2076_s5, 8192 }
 0x1c9   : > { %p1408_p6 = scmp.ne.s32.totalorder %s2018_s24, %s1407_s11  ;;  %p1412_p10 = scmp.lt.s32.totalorder %s2018_s24, %s2076_s5 }
 0x1ca   : > { %p1413_p11 = scmp.lt.s32.totalorder %s1411_s10, %s1407_s11 }
 0x1cb   : > { %p1409_p7 = pnand %p1408_p6, %p1544_p4 }
 0x1cc   : > { %p1414_p12 = por %p1413_p11, %p1412_p10 }
 0x1cd   : > { %p1410_p9 = pneg %p1409_p7 }
 0x1cf   : > { %p1415_p13 = pnand %p1414_p12, %p1410_p9 }
 0x1d1   : > { %1418 = shalt.err (!%p1415_p13)
}
 0x1d2   : > { %s1472_s15 = smov 128   ;;  %s1473_s16 = smov 8  }
 0x1d3   : > { %1272 = dma.vmem_to_hbm [thread:$0]  (%p1544_p4), %s2020_s13, 4096, %s2018_s24, %s2026_s21, %s1472_s15, %s1472_s15, %s1473_s16  }
 0x1d4 PF: > { %p1278_p0 = scmp.ge.s32.totalorder %s1469_s23, 2  ;;  %s1033_s17 = sand.u32 1, %s1449_s18  }
 0x1d5   : > { %s1034_s25 = scalar_lea.sflag [#allocation3], %s1033_s17 }
 0x1d6   : > { %p1275_p1 = pnand %p1278_p0, %p1551_p8 }
 0x1d8   : > { %p1276_p2 = pneg %p1275_p1 }
 0x1da   : > { %1444 = dma.done.wait (%p1276_p2), %s1034_s25, 4096  }
 0x1db   : > { %1446 = vsyncadd (%p1276_p2), %s1034_s25, 4294963200  ;;  %s18_s23 = sadd.s32 1, %s1469_s23   ;;  %s2079_s18 = smov %s1453_s19 }
 0x1dc   : > { %p15_p3 = scmp.ge.s32.totalorder %s18_s23, 4   ;;  %s2080_s19 = smov %s1457_s20 }
 0x1dd   : > { %s2081_s20 = smov %s1557_s6  ;;  %s2082_s21 = smov %s1465_s22 }
 0x1de   : > { %s2083_s22 = smov %s2085_s26  ;;  %17 = sbr.rel (!%p15_p3) target bundleno = 4 (0x4), region = 78 }
 0x1e3   :  { %1039 = vsyncpa [#allocation3], 1 }
 0x1e4   :  { %1041 = vsyncpa [#allocation3 + $0x1], 1 }

</bundles_post_ra>
